<compile_context>
chip_gen: v7x
topology: tpu7x:2x2x1
jax: 0.10.0
libtpu: 0.0.40
codegen_flags: <defaults>
</compile_context>

<pallas_src>
import jax
import jax.numpy as jnp
from jax.experimental import pallas as pl
from jax.experimental.pallas import tpu as pltpu

# ---- problem sizes (Iris: 4 features, 3 classes) ----
INPUT_SIZE = 4
HIDDEN_SIZE = 32
NUM_CLASSES = 3

PAD_OUT = 128   # logits lane dim padded to 128 -> unmasked vst stores
TILE_B = 256    # batch tile for the gridded (serving-batch) path


def mlp_kernel(x_ref, w1_ref, b1_ref, w2_ref, b2_ref, o_ref):
    """h = relu(x @ W1 + b1); o = h @ W2 + b2, all in f32 (f32 MXU accumulation)."""
    h = jnp.dot(x_ref[...], w1_ref[...], preferred_element_type=jnp.float32)
    h = jnp.maximum(h + b1_ref[...], 0.0)
    # Dropout(p=0.2) is identity in eval/inference mode (matches model.eval()).
    # TODO(synk): training-mode dropout (pltpu.prng_random_bits mask + 1/(1-p) scale) not emitted.
    o_ref[...] = jnp.dot(h, w2_ref[...], preferred_element_type=jnp.float32) + b2_ref[...]


def prepare_params(w1, b1, w2, b2):
    """One-time packing of weights into kernel layout (off the per-call critical path).
    Only fc2 is padded along the class dim (3 -> 128); fc1 keeps its natural (4, 32)."""
    w1p = w1.astype(jnp.float32)                                        # (4, 32)
    b1p = b1.astype(jnp.float32).reshape(1, HIDDEN_SIZE)                # (1, 32)
    w2p = jnp.zeros((HIDDEN_SIZE, PAD_OUT), jnp.float32).at[:, :NUM_CLASSES].set(
        w2.astype(jnp.float32))                                         # (32, 128)
    b2p = jnp.zeros((1, PAD_OUT), jnp.float32).at[0, :NUM_CLASSES].set(
        b2.astype(jnp.float32))                                         # (1, 128)
    return w1p, b1p, w2p, b2p


@jax.jit
def iris_forward_padded(x, w1p, b1p, w2p, b2p):
    """x: (B, 4) f32. Returns PADDED logits (pb, 128) f32.
    Rows >= B and lanes >= NUM_CLASSES are padding and must be ignored/masked by the
    consumer (keeping them avoids an extra HBM pass for a slice HLO)."""
    B = x.shape[0]

    if B <= TILE_B:
        # Gridless single-shot kernel: full-array blocks, no pipeline/grid scaffolding.
        return pl.pallas_call(
            mlp_kernel,
            out_shape=jax.ShapeDtypeStruct((B, PAD_OUT), jnp.float32),
        )(x, w1p, b1p, w2p, b2p)

    # Tiled path for real serving batches.
    nb = pl.cdiv(B, TILE_B)
    pb = nb * TILE_B
    if pb != B:
        x = jnp.pad(x, ((0, pb - B), (0, 0)))
    return pl.pallas_call(
        mlp_kernel,
        out_shape=jax.ShapeDtypeStruct((pb, PAD_OUT), jnp.float32),
        grid=(nb,),
        in_specs=[
            # x streams per batch tile; full (tiny) feature dim is exempt from the 128 rule.
            pl.BlockSpec((TILE_B, INPUT_SIZE), lambda i: (i, 0)),
            # Weights/biases: constant block index -> DMA'd once, VMEM-resident across tiles.
            pl.BlockSpec((INPUT_SIZE, HIDDEN_SIZE), lambda i: (0, 0)),
            pl.BlockSpec((1, HIDDEN_SIZE), lambda i: (0, 0)),
            pl.BlockSpec((HIDDEN_SIZE, PAD_OUT), lambda i: (0, 0)),
            pl.BlockSpec((1, PAD_OUT), lambda i: (0, 0)),
        ],
        out_specs=pl.BlockSpec((TILE_B, PAD_OUT), lambda i: (i, 0)),
        compiler_params=pltpu.CompilerParams(
            dimension_semantics=("parallel",)),  # shards batch tiles across v7x TensorCores
    )(x, w1p, b1p, w2p, b2p)


def iris_classifier_forward(x, w1p, b1p, w2p, b2p):
    """API-parity wrapper returning (B, NUM_CLASSES) f32 logits.
    Prefer consuming iris_forward_padded directly (or fusing argmax) to skip this slice."""
    return iris_forward_padded(x, w1p, b1p, w2p, b2p)[: x.shape[0], :NUM_CLASSES]


def init_params(key):
    """Deterministic init matching nn.Linear shapes (W stored as (in, out))."""
    k1, k2, k3, k4 = jax.random.split(key, 4)
    bound1 = 1.0 / (INPUT_SIZE ** 0.5)
    bound2 = 1.0 / (HIDDEN_SIZE ** 0.5)
    w1 = jax.random.uniform(k1, (INPUT_SIZE, HIDDEN_SIZE), jnp.float32, -bound1, bound1)
    b1 = jax.random.uniform(k2, (HIDDEN_SIZE,), jnp.float32, -bound1, bound1)
    w2 = jax.random.uniform(k3, (HIDDEN_SIZE, NUM_CLASSES), jnp.float32, -bound2, bound2)
    b2 = jax.random.uniform(k4, (NUM_CLASSES,), jnp.float32, -bound2, bound2)
    return w1, b1, w2, b2


def _reference(x, w1, b1, w2, b2):
    h = jnp.maximum(jnp.dot(x, w1, precision="highest") + b1, 0.0)
    return jnp.dot(h, w2, precision="highest") + b2


if __name__ == "__main__":
    BATCH = 8
    key = jax.random.PRNGKey(0)
    k_x, k_p = jax.random.split(key)
    x = jax.random.normal(k_x, (BATCH, INPUT_SIZE), jnp.float32)
    w1, b1, w2, b2 = init_params(k_p)

    # Pack weights ONCE (model init / load time).
    w1p, b1p, w2p, b2p = prepare_params(w1, b1, w2, b2)

    # Small-batch (gridless) path -- the Iris demo.
    logits = jax.block_until_ready(iris_classifier_forward(x, w1p, b1p, w2p, b2p))
    assert logits.shape == (BATCH, NUM_CLASSES)
    ref = _reference(x, w1, b1, w2, b2)
    assert jnp.allclose(logits, ref, atol=1e-3, rtol=1e-3), \
        float(jnp.max(jnp.abs(logits - ref)))

    # Tiled (grid) path -- exercise batch padding + multi-tile execution.
    xb = jax.random.normal(k_x, (3 * TILE_B + 5, INPUT_SIZE), jnp.float32)
    logits_big = jax.block_until_ready(iris_classifier_forward(xb, w1p, b1p, w2p, b2p))
    ref_big = _reference(xb, w1, b1, w2, b2)
    assert logits_big.shape == (xb.shape[0], NUM_CLASSES)
    assert jnp.allclose(logits_big, ref_big, atol=1e-3, rtol=1e-3), \
        float(jnp.max(jnp.abs(logits_big - ref_big)))

    print("KERNEL_OK")
</pallas_src>

<mosaic_0001>
module attributes {stable_mosaic.version = 11 : i64} {
  func.func @mlp_kernel(%arg0: memref<8x4xf32, #tpu.memory_space<vmem>>, %arg1: memref<4x32xf32, #tpu.memory_space<vmem>>, %arg2: memref<1x32xf32, #tpu.memory_space<vmem>>, %arg3: memref<32x128xf32, #tpu.memory_space<vmem>>, %arg4: memref<1x128xf32, #tpu.memory_space<vmem>>, %arg5: memref<8x128xf32, #tpu.memory_space<vmem>>) attributes {dimension_semantics = [], scalar_prefetch = 0 : i64, scratch_operands = 0 : i64, tpu.core_type = #tpu.core_type<tc>} {
    %c0 = arith.constant 0 : index
    %c0_0 = arith.constant 0 : index
    %0 = vector.load %arg0[%c0, %c0_0] : memref<8x4xf32, #tpu.memory_space<vmem>>, vector<8x4xf32>
    %c0_1 = arith.constant 0 : index
    %c0_2 = arith.constant 0 : index
    %1 = vector.load %arg1[%c0_1, %c0_2] : memref<4x32xf32, #tpu.memory_space<vmem>>, vector<4x32xf32>
    %cst = arith.constant dense<0.000000e+00> : vector<8x32xf32>
    %2 = tpu.matmul %0, %1, %cst {dimension_numbers = #tpu.dot_dimension_numbers<[1], [0], [0], [1], [0, 0, 1, 1], [], []>} : vector<8x4xf32>, vector<4x32xf32>, vector<8x32xf32> -> vector<8x32xf32>
    %c0_3 = arith.constant 0 : index
    %c0_4 = arith.constant 0 : index
    %3 = vector.load %arg2[%c0_3, %c0_4] : memref<1x32xf32, #tpu.memory_space<vmem>>, vector<1x32xf32>
    %4 = vector.broadcast %3 : vector<1x32xf32> to vector<8x32xf32>
    %5 = arith.addf %2, %4 : vector<8x32xf32>
    %cst_5 = arith.constant 0.000000e+00 : f32
    %6 = vector.broadcast %cst_5 : f32 to vector<8x32xf32>
    %7 = arith.maximumf %5, %6 : vector<8x32xf32>
    %c0_6 = arith.constant 0 : index
    %c0_7 = arith.constant 0 : index
    %8 = vector.load %arg3[%c0_6, %c0_7] : memref<32x128xf32, #tpu.memory_space<vmem>>, vector<32x128xf32>
    %cst_8 = arith.constant dense<0.000000e+00> : vector<8x128xf32>
    %9 = tpu.matmul %7, %8, %cst_8 {dimension_numbers = #tpu.dot_dimension_numbers<[1], [0], [0], [1], [0, 0, 1, 1], [], []>} : vector<8x32xf32>, vector<32x128xf32>, vector<8x128xf32> -> vector<8x128xf32>
    %c0_9 = arith.constant 0 : index
    %c0_10 = arith.constant 0 : index
    %10 = vector.load %arg4[%c0_9, %c0_10] : memref<1x128xf32, #tpu.memory_space<vmem>>, vector<1x128xf32>
    %11 = vector.broadcast %10 : vector<1x128xf32> to vector<8x128xf32>
    %12 = arith.addf %9, %11 : vector<8x128xf32>
    %c0_11 = arith.constant 0 : index
    %c0_12 = arith.constant 0 : index
    %13 = vector.load %arg5[%c0_11, %c0_12] : memref<8x128xf32, #tpu.memory_space<vmem>>, vector<8x128xf32>
    tpu.vector_store %arg5[%c0_11, %c0_12], %12 {strides = array<i32>} : memref<8x128xf32, #tpu.memory_space<vmem>>, vector<8x128xf32>,
    return
  }
}

</mosaic_0001>

<bundles_post_ra>
// kernel: iris_forward_padded.1
= control target key start
LH: loop header
LB: loop body
LE: loop exit
PB: predicated region body
PF: predicated region fallthrough
CT: control target
= control target key end

     0   :  { %10 = vsyncpa [#allocation3], 0  ;;  %s386_s0 = inlined_call_operand.vmem [shape: f32[8,4], index: 0, kind: input, shape index: {}]   ;;  %s387_s1 = inlined_call_operand.vmem [shape: f32[4,32], index: 1, kind: input, shape index: {}]   ;;  %s388_s2 = inlined_call_operand.vmem [shape: f32[1,32], index: 2, kind: input, shape index: {}]   ;;  %s389_s3 = inlined_call_operand.hbm [shape: f32[32,128], index: 3, kind: input, shape index: {}]   ;;  %s390_s4 = inlined_call_operand.vmem [shape: f32[1,128], index: 4, kind: input, shape index: {}]   ;;  %s391_s5 = inlined_call_operand.hbm [shape: f32[8,128], index: 5, kind: output, shape index: {}]  }
   0x1   :  { %11 = vsyncpa [#allocation4], 0  ;;  %s313_s18 = smov [#allocation2]   ;;  %s265_s22 = scalar_lea.hbm %s389_s3, 512 }
   0x2   :  { %s23_s19 = sshll.u32 %s313_s18, 4  ;;  %p266_p0 = scmp.ne.s32.totalorder %s389_s3, %s265_s22  ;;  %s24_s19 = int_to_ptr.vmem [resolvable:$true] %s23_s19 }
   0x3   :  { %p269_p1 = scmp.lt.u32.totalorder %s265_s22, %s389_s3 }
   0x5   :  { %p271_p2 = pnand %p269_p1, %p266_p0 }
   0x7   :  { %274 = shalt.err (!%p271_p2)
}
   0x8   :  { %s275_s27 = scalar_lea.vmem %s24_s19, 512  ;;  %p280_p4 = scmp.lt.s32.totalorder %s24_s19, %s24_s19 }
   0x9   :  { %p276_p3 = scmp.ne.s32.totalorder %s24_s19, %s275_s27  ;;  %p281_p5 = scmp.lt.s32.totalorder %s275_s27, %s275_s27 }
   0xb   :  { %p282_p6 = por %p281_p5, %p280_p4 }
   0xd   :  { %p283_p7 = pnand %p282_p6, %p276_p3 }
   0xf   :  { %286 = shalt.err (!%p283_p7)
}
  0x10   :  { %s314_s28 = smov 128   ;;  %s315_s29 = smov 8  }
  0x11   :  { %29 = dma.hbm_to_vmem [thread:$0]  %s389_s3, 512, %s24_s19, [#allocation3], %s314_s28, %s314_s28, %s315_s29  }
  0x12   :  { %309 = dma.done.wait [#allocation3], 512  }
  0x13   :  { %310 = vsyncadd [#allocation3], 4294966784  ;;  %v316_v0 = vmov 0.0   ;;  %vm317_vm0 = vmmov 0   ;;  %v318_v1 = vmov 0.0|0.0   ;;  %vm48_vm1 = vcmask 1043456  }
  0x14   :  { %236 = vmatprep.subr.mxu0 %v316_v0  ;;  %238 = vmatprep.mubr.msk.f32.mxu0 %vm317_vm0, %v316_v0  ;;  %vm44_vm2 = vcmask 31744   ;;  %v36_v2 = vld [vmem:[%s387_s1] sm:$0xf]  ;;  %v124_v5 = vld [vmem:[#allocation2 + $0x8] sm:$0xff]  ;;  %v125_v7 = vld [vmem:[#allocation2 + $0x10] sm:$0xff]  ;;  %vm134_vm3 = vcmask 261120  }
  0x15   :  { %252 = vmatprep.subr.bf16.mxu1 %v318_v1  ;;  %249 = vmatprep.mubr.msk.f32.mxu1 %vm317_vm0, %v316_v0  ;;  %v35_v3 = vld [vmem:[%s386_s0] sm:$0xff]  ;;  %v126_v8 = vld [vmem:[#allocation2 + $0x18] sm:$0xff]  ;;  %s319_s12 = smov [#allocation5]  }
  0x16   :  { %v123_v4 = vld [vmem:[#allocation2] sm:$0xff]  ;;  %237 = vmatpush3.msk.msra.mxu0 %vm48_vm1, %v36_v2  ;;  %v256_v9 = vpack.c.bf16 %v126_v8, %v125_v7  ;;  %s215_s13 = sshll.u32 %s319_s12, 4  ;;  %s216_s13 = int_to_ptr.vmem [resolvable:$true] %s215_s13 }
  0x17   :  { %239 = vmatmul.mubr.msk.f32.vlgmr.msra.gmra.mrb[0].mxu0 %vm44_vm2, %v35_v3  ;;  %v253_v6 = vpack.c.bf16 %v124_v5, %v123_v4  ;;  %v224_v10 = vld [vmem:[%s388_s2] ss:$0 sm:$0xff]  ;;  %s287_s14 = scalar_lea.vmem %s216_s13, 128  ;;  %p292_p9 = scmp.lt.s32.totalorder %s216_s13, %s216_s13 }
  0x18   :  { %v227_v15 = vld [vmem:[%s390_s4] ss:$0 sm:$0xff]  ;;  %p288_p8 = scmp.ne.s32.totalorder %s216_s13, %s287_s14  ;;  %p293_p10 = scmp.lt.s32.totalorder %s287_s14, %s287_s14 }
  0x19   :  { %254 = vmatpush3.bf16.msra.mxu1 %v253_v6 }
  0x1a   :  { %255 = vmatprep.subr.bf16.mxu1 %v318_v1  ;;  %p294_p11 = por %p293_p10, %p292_p9 }
  0x1c   :  { %p295_p12 = pnand %p294_p11, %p288_p8 }
  0x1d   :  { %257 = vmatpush3.bf16.msra.mxu1 %v256_v9 }
  0xea   :  { %v118_v11 = vpop.f32.mrb[0].mxu0 }
  0xeb   :  { %v119_v12 = vadd.f32 %v224_v10, %v118_v11  ;;  %v240_v13 = vpop.f32.mrb[1].mxu0 }
  0xed   :  { %v122_v14 = vmax.f32 %v119_v12, 0.0 }
  0xef   :  { %250 = vmatmul.mubr.msk.f32.vlgmr.msra.gmra.mrb[0].mxu1 %vm134_vm3, %v122_v14 }
 0x1c2   :  { %v204_v16 = vpop.f32.mrb[0].mxu1 }
 0x1c3   :  { %v205_v17 = vadd.f32 %v227_v15, %v204_v16  ;;  %v251_v18 = vpop.f32.mrb[1].mxu1 }
 0x1c5   :  { %208 = vst [vmem:[#allocation5] sm:$0xff] %v205_v17 }
 0x1c6   :  { %298 = shalt.err (!%p295_p12)
}
 0x1c7   :  { %s299_s16 = scalar_lea.hbm %s391_s5, 128 }
 0x1c8   :  { %p300_p13 = scmp.ne.s32.totalorder %s391_s5, %s299_s16  ;;  %p303_p0 = scmp.lt.u32.totalorder %s299_s16, %s391_s5 }
 0x1ca   :  { %p305_p1 = pnand %p303_p0, %p300_p13 }
 0x1cc   :  { %308 = shalt.err (!%p305_p1)
}
 0x1cd   :  { %218 = dma.vmem_to_hbm [thread:$0]  %s216_s13, 128, %s391_s5, [#allocation4]  }
 0x1ce   :  { %311 = dma.done.wait [#allocation4], 128  }
 0x1cf   :  { %312 = vsyncadd [#allocation4], 4294967168 }
 0x1d0   :  { %222 = vsyncpa [#allocation3], 1 }
 0x1d1   :  { %223 = vsyncpa [#allocation4], 1 }

</bundles_post_ra>
